<compile_context>
chip_gen: v6e
topology: v6e:2x2x1
jax: 0.10.0
libtpu: 0.0.40
codegen_flags: <defaults>
</compile_context>

<pallas_src>
import numpy as np

import jax
import jax.numpy as jnp
from jax.experimental import pallas as pl
from jax.experimental.pallas import tpu as pltpu


def _round_up(n, m):
    return ((n + m - 1) // m) * m


# ----------------------------------------------------------------------------
# Host-side parameter packing: every weight/bias into one (R, Cmax) f32 array.
# ----------------------------------------------------------------------------
def _pack_params(params):
    entries = []

    def add(arr2d):
        entries.append(np.asarray(arr2d, np.float32))
        return len(entries) - 1

    meta = []
    for i, b in enumerate(params["blocks"]):
        K, Cin, Cout = b["w1"].shape
        d = 2 ** i
        p = (K - 1) * d
        has_down = "wd" in b
        m = dict(K=K, d=d, p=p, Cin=Cin, Cout=Cout, has_down=has_down,
                 w1=add(np.asarray(b["w1"]).reshape(K * Cin, Cout)),   # im2col weight
                 b1=add(b["b1"]),
                 w2=add(np.asarray(b["w2"]).reshape(K * Cout, Cout)),
                 b2=add(b["b2"]))
        if has_down:
            m["wd"] = add(np.asarray(b["wd"])[0])                      # (Cin, Cout)
            m["bd"] = add(b["bd"])
        meta.append(m)
    head = dict(lw=add(params["lin_w"]), lb=add(params["lin_b"]))

    cmax = max(a.shape[1] for a in entries)
    offsets, r = [], 0
    for a in entries:
        offsets.append(r)
        r += _round_up(a.shape[0], 8)          # keep every slice sublane-aligned
    packed = np.zeros((_round_up(r, 8), cmax), np.float32)
    for off, a in zip(offsets, entries):
        packed[off:off + a.shape[0], :a.shape[1]] = a

    def ent(idx):
        a = entries[idx]
        return (offsets[idx], a.shape[0], a.shape[1])

    for m in meta:
        keys = ("w1", "b1", "w2", "b2") + (("wd", "bd") if m["has_down"] else ())
        for k in keys:
            m[k] = ent(m[k])
    head = {k: ent(v) for k, v in head.items()}
    return jnp.asarray(packed), meta, head


# ----------------------------------------------------------------------------
# Fused forward kernel (grid-less, everything stays in vregs/VMEM)
# ----------------------------------------------------------------------------
def _build_fused_kernel(B, L, meta, head):
    BL = B * L

    def kernel(x_ref, p_ref, o_ref):
        f32 = jnp.float32

        def read(ent):                           # static slice of the packed params
            r0, rows, cols = ent
            return p_ref[r0:r0 + rows, 0:cols]

        # Global row index (batch folded into the sublane/M dimension).
        row = jax.lax.broadcasted_iota(jnp.int32, (BL, 1), 0)

        mask_cache = {}

        def keep_mask(s):
            # True for rows whose per-batch timestep >= s (i.e. NOT in the
            # causal zero-pad region of any batch).  Pure compares -> VPU.
            if s not in mask_cache:
                keep = None
                for b in range(B):
                    lo, hi = b * L, b * L + s
                    ok = (row < lo) | (row >= hi)
                    keep = ok if keep is None else (keep & ok)
                mask_cache[s] = keep
            return mask_cache[s]

        def causal_conv(h, w_ent, b_ent, K, d, p):
            # Dilated causal conv as ONE im2col dot.  Tap j needs h[t - (p - j*d)]
            # with zeros for negative timesteps; realised as roll (XLU) + mask.
            wins = []
            for j in range(K):
                s = p - j * d
                if s == 0:
                    wins.append(h)
                else:
                    rolled = pltpu.roll(h, shift=s, axis=0)      # sublane rotate
                    wins.append(jnp.where(keep_mask(s), rolled, 0.0))
            cat = jnp.concatenate(wins, axis=-1) if len(wins) > 1 else wins[0]
            return jnp.dot(cat, read(w_ent), preferred_element_type=f32) + read(b_ent)

        h = x_ref[...].astype(f32)                               # (B*L, C0)
        for m in meta:
            K, d, p = m["K"], m["d"], m["p"]
            # conv1 -> ReLU (dropout == identity in eval mode)
            y1 = jnp.maximum(causal_conv(h, m["w1"], m["b1"], K, d, p), 0.0)
            # residual path (1x1 downsample fused, single dot over B*L rows)
            if m["has_down"]:
                res = jnp.dot(h, read(m["wd"]),
                              preferred_element_type=f32) + read(m["bd"])
            else:
                res = h
            # conv2 -> ReLU, then +res -> ReLU (only the first L outputs are live)
            y2 = jnp.maximum(causal_conv(y1, m["w2"], m["b2"], K, d, p), 0.0)
            h = jnp.maximum(y2 + res, 0.0)                       # (B*L, Cout)

        # Head: static slices of the per-batch last-timestep rows, one dot, one store.
        c_last = meta[-1]["Cout"]
        last = jnp.concatenate(
            [jax.lax.slice(h, (b * L + L - 1, 0), (b * L + L, c_last))
             for b in range(B)], axis=0)                         # (B, C_last)
        out = jnp.dot(last, read(head["lw"]),
                      preferred_element_type=f32) + read(head["lb"])
        o_ref[...] = out.astype(o_ref.dtype)                     # only HBM write

    return kernel


def tcn_forecaster_forward(params, x):
    """x: (B, seq_len, input_size) -> (B, output_size). Single fused Pallas call."""
    if x.ndim == 2:                              # mirror the PyTorch unsqueeze(0)
        x = x[None]
    B, L, C0 = x.shape
    out_size = params["lin_w"].shape[1]

    packed, meta, head = _pack_params(params)
    x2d = jnp.asarray(x, jnp.float32).reshape(B * L, C0)   # batch folded into M

    vmem = pl.BlockSpec(memory_space=pltpu.MemorySpace.VMEM)
    return pl.pallas_call(
        _build_fused_kernel(B, L, meta, head),
        out_shape=jax.ShapeDtypeStruct((B, out_size), jnp.float32),
        in_specs=[vmem, vmem],
        out_specs=vmem,
    )(x2d, packed)


# ----------------------------------------------------------------------------
# Parameters (deterministic synthetic init, shapes from the PyTorch __init__)
# ----------------------------------------------------------------------------
def init_params(key, input_size, output_size, num_channels, kernel_size):
    params = {"blocks": []}
    in_c = input_size
    for out_c in num_channels:
        key, k1, k2, k3, k4, k5, k6 = jax.random.split(key, 7)
        blk = {
            "w1": 0.1 * jax.random.normal(k1, (kernel_size, in_c, out_c), jnp.float32),
            "b1": 0.1 * jax.random.normal(k2, (1, out_c), jnp.float32),
            "w2": 0.1 * jax.random.normal(k3, (kernel_size, out_c, out_c), jnp.float32),
            "b2": 0.1 * jax.random.normal(k4, (1, out_c), jnp.float32),
        }
        if in_c != out_c:  # 1x1 downsample conv
            blk["wd"] = 0.1 * jax.random.normal(k5, (1, in_c, out_c), jnp.float32)
            blk["bd"] = 0.1 * jax.random.normal(k6, (1, out_c), jnp.float32)
        params["blocks"].append(blk)
        in_c = out_c
    key, k1, k2 = jax.random.split(key, 3)
    params["lin_w"] = 0.1 * jax.random.normal(k1, (num_channels[-1], output_size), jnp.float32)
    params["lin_b"] = 0.1 * jax.random.normal(k2, (1, output_size), jnp.float32)
    return params


# ----------------------------------------------------------------------------
# Pure-JAX reference (PyTorch semantics: symmetric pad + chomp) for correctness
# ----------------------------------------------------------------------------
def _ref_conv(inp, w, b, dil, pad):
    K = w.shape[0]
    xp = jnp.pad(inp, ((0, 0), (pad, pad), (0, 0))) if pad > 0 else inp
    Lout = inp.shape[1] + 2 * pad - dil * (K - 1)
    acc = jnp.zeros((inp.shape[0], Lout, w.shape[2]), jnp.float32)
    for j in range(K):
        acc = acc + jnp.einsum("blc,cd->bld", xp[:, j * dil: j * dil + Lout, :], w[j])
    return acc + b


def ref_forward(params, x, kernel_size):
    h = x
    for i, blk in enumerate(params["blocks"]):
        d = 2 ** i
        p = (kernel_size - 1) * d
        L = h.shape[1]
        y1 = jax.nn.relu(_ref_conv(h, blk["w1"], blk["b1"], d, p))
        y2 = jax.nn.relu(_ref_conv(y1, blk["w2"], blk["b2"], d, p))
        res = h if "wd" not in blk else _ref_conv(h, blk["wd"], blk["bd"], 1, 0)
        out = y2[:, :L, :]                   # Chomp: trim to residual length
        h = jax.nn.relu(out + res)
    return h[:, -1, :] @ params["lin_w"] + params["lin_b"]


# ----------------------------------------------------------------------------
if __name__ == "__main__":
    key = jax.random.PRNGKey(0)
    B, seq_len = 2, 16
    input_size, output_size = 4, 3
    num_channels = [8, 16]
    kernel_size = 3

    kp, kx = jax.random.split(key)
    params = init_params(kp, input_size, output_size, num_channels, kernel_size)
    x = jax.random.normal(kx, (B, seq_len, input_size), jnp.float32)

    out = tcn_forecaster_forward(params, x)
    out = jax.block_until_ready(out)

    ref = ref_forward(params, x, kernel_size)
    assert out.shape == (B, output_size), out.shape
    assert jnp.allclose(out, ref, atol=1e-4, rtol=1e-4), (out, ref)

    # TODO(synk): nn.Dropout is treated as identity (eval semantics only).
    print("KERNEL_OK")
</pallas_src>

<mosaic_0001>
module attributes {stable_mosaic.version = 11 : i64} {
  func.func @kernel(%arg0: memref<32x4xf32, #tpu.memory_space<vmem>>, %arg1: memref<200x16xf32, #tpu.memory_space<vmem>>, %arg2: memref<2x3xf32, #tpu.memory_space<vmem>>) attributes {dimension_semantics = [], scalar_prefetch = 0 : i64, scratch_operands = 0 : i64, tpu.core_type = #tpu.core_type<tc>} {
    %0 = tpu.iota {dimensions = array<i32: 0>} : vector<32x1xi32>
    %c0 = arith.constant 0 : index
    %c0_0 = arith.constant 0 : index
    %1 = vector.load %arg0[%c0, %c0_0] : memref<32x4xf32, #tpu.memory_space<vmem>>, vector<32x4xf32>
    %c2_i32 = arith.constant 2 : i32
    %2 = tpu.dynamic_rotate %1 by %c2_i32 dim 0 : vector<32x4xf32>, i32 -> vector<32x4xf32>
    %c0_i32 = arith.constant 0 : i32
    %3 = vector.broadcast %c0_i32 : i32 to vector<32x1xi32>
    %4 = arith.cmpi slt, %0, %3 : vector<32x1xi32>
    %c2_i32_1 = arith.constant 2 : i32
    %5 = vector.broadcast %c2_i32_1 : i32 to vector<32x1xi32>
    %6 = arith.cmpi sge, %0, %5 : vector<32x1xi32>
    %7 = arith.ori %4, %6 : vector<32x1xi1>
    %c16_i32 = arith.constant 16 : i32
    %8 = vector.broadcast %c16_i32 : i32 to vector<32x1xi32>
    %9 = arith.cmpi slt, %0, %8 : vector<32x1xi32>
    %c18_i32 = arith.constant 18 : i32
    %10 = vector.broadcast %c18_i32 : i32 to vector<32x1xi32>
    %11 = arith.cmpi sge, %0, %10 : vector<32x1xi32>
    %12 = arith.ori %9, %11 : vector<32x1xi1>
    %13 = arith.andi %7, %12 : vector<32x1xi1>
    %cst = arith.constant 0.000000e+00 : f32
    %14 = vector.shape_cast %13 : vector<32x1xi1> to vector<32x1xi1>
    %15 = vector.broadcast %14 : vector<32x1xi1> to vector<32x4xi1>
    %16 = vector.broadcast %cst : f32 to vector<32x4xf32>
    %17 = arith.select %15, %2, %16 : vector<32x4xi1>, vector<32x4xf32>
    %c1_i32 = arith.constant 1 : i32
    %18 = tpu.dynamic_rotate %1 by %c1_i32 dim 0 : vector<32x4xf32>, i32 -> vector<32x4xf32>
    %c0_i32_2 = arith.constant 0 : i32
    %19 = vector.broadcast %c0_i32_2 : i32 to vector<32x1xi32>
    %20 = arith.cmpi slt, %0, %19 : vector<32x1xi32>
    %c1_i32_3 = arith.constant 1 : i32
    %21 = vector.broadcast %c1_i32_3 : i32 to vector<32x1xi32>
    %22 = arith.cmpi sge, %0, %21 : vector<32x1xi32>
    %23 = arith.ori %20, %22 : vector<32x1xi1>
    %c16_i32_4 = arith.constant 16 : i32
    %24 = vector.broadcast %c16_i32_4 : i32 to vector<32x1xi32>
    %25 = arith.cmpi slt, %0, %24 : vector<32x1xi32>
    %c17_i32 = arith.constant 17 : i32
    %26 = vector.broadcast %c17_i32 : i32 to vector<32x1xi32>
    %27 = arith.cmpi sge, %0, %26 : vector<32x1xi32>
    %28 = arith.ori %25, %27 : vector<32x1xi1>
    %29 = arith.andi %23, %28 : vector<32x1xi1>
    %cst_5 = arith.constant 0.000000e+00 : f32
    %30 = vector.shape_cast %29 : vector<32x1xi1> to vector<32x1xi1>
    %31 = vector.broadcast %30 : vector<32x1xi1> to vector<32x4xi1>
    %32 = vector.broadcast %cst_5 : f32 to vector<32x4xf32>
    %33 = arith.select %31, %18, %32 : vector<32x4xi1>, vector<32x4xf32>
    %34 = tpu.concatenate %17, %33, %1 in 1 : vector<32x4xf32>, vector<32x4xf32>, vector<32x4xf32> -> vector<32x12xf32>
    %c0_6 = arith.constant 0 : index
    %c0_7 = arith.constant 0 : index
    %35 = vector.load %arg1[%c0_6, %c0_7] : memref<200x16xf32, #tpu.memory_space<vmem>>, vector<12x8xf32>
    %cst_8 = arith.constant dense<0.000000e+00> : vector<32x8xf32>
    %36 = tpu.matmul %34, %35, %cst_8 {dimension_numbers = #tpu.dot_dimension_numbers<[1], [0], [0], [1], [0, 0, 1, 1], [], []>} : vector<32x12xf32>, vector<12x8xf32>, vector<32x8xf32> -> vector<32x8xf32>
    %c16 = arith.constant 16 : index
    %c0_9 = arith.constant 0 : index
    %37 = vector.load %arg1[%c16, %c0_9] : memref<200x16xf32, #tpu.memory_space<vmem>>, vector<1x8xf32>
    %38 = vector.broadcast %37 : vector<1x8xf32> to vector<32x8xf32>
    %39 = arith.addf %36, %38 : vector<32x8xf32>
    %cst_10 = arith.constant 0.000000e+00 : f32
    %40 = vector.broadcast %cst_10 : f32 to vector<32x8xf32>
    %41 = arith.maximumf %39, %40 : vector<32x8xf32>
    %c56 = arith.constant 56 : index
    %c0_11 = arith.constant 0 : index
    %42 = vector.load %arg1[%c56, %c0_11] : memref<200x16xf32, #tpu.memory_space<vmem>>, vector<4x8xf32>
    %cst_12 = arith.constant dense<0.000000e+00> : vector<32x8xf32>
    %43 = tpu.matmul %1, %42, %cst_12 {dimension_numbers = #tpu.dot_dimension_numbers<[1], [0], [0], [1], [0, 0, 1, 1], [], []>} : vector<32x4xf32>, vector<4x8xf32>, vector<32x8xf32> -> vector<32x8xf32>
    %c64 = arith.constant 64 : index
    %c0_13 = arith.constant 0 : index
    %44 = vector.load %arg1[%c64, %c0_13] : memref<200x16xf32, #tpu.memory_space<vmem>>, vector<1x8xf32>
    %45 = vector.broadcast %44 : vector<1x8xf32> to vector<32x8xf32>
    %46 = arith.addf %43, %45 : vector<32x8xf32>
    %c2_i32_14 = arith.constant 2 : i32
    %47 = tpu.dynamic_rotate %41 by %c2_i32_14 dim 0 : vector<32x8xf32>, i32 -> vector<32x8xf32>
    %cst_15 = arith.constant 0.000000e+00 : f32
    %48 = vector.shape_cast %13 : vector<32x1xi1> to vector<32x1xi1>
    %49 = vector.broadcast %48 : vector<32x1xi1> to vector<32x8xi1>
    %50 = vector.broadcast %cst_15 : f32 to vector<32x8xf32>
    %51 = arith.select %49, %47, %50 : vector<32x8xi1>, vector<32x8xf32>
    %c1_i32_16 = arith.constant 1 : i32
    %52 = tpu.dynamic_rotate %41 by %c1_i32_16 dim 0 : vector<32x8xf32>, i32 -> vector<32x8xf32>
    %cst_17 = arith.constant 0.000000e+00 : f32
    %53 = vector.shape_cast %29 : vector<32x1xi1> to vector<32x1xi1>
    %54 = vector.broadcast %53 : vector<32x1xi1> to vector<32x8xi1>
    %55 = vector.broadcast %cst_17 : f32 to vector<32x8xf32>
    %56 = arith.select %54, %52, %55 : vector<32x8xi1>, vector<32x8xf32>
    %57 = tpu.concatenate %51, %56, %41 in 1 : vector<32x8xf32>, vector<32x8xf32>, vector<32x8xf32> -> vector<32x24xf32>
    %c24 = arith.constant 24 : index
    %c0_18 = arith.constant 0 : index
    %58 = vector.load %arg1[%c24, %c0_18] : memref<200x16xf32, #tpu.memory_space<vmem>>, vector<24x8xf32>
    %cst_19 = arith.constant dense<0.000000e+00> : vector<32x8xf32>
    %59 = tpu.matmul %57, %58, %cst_19 {dimension_numbers = #tpu.dot_dimension_numbers<[1], [0], [0], [1], [0, 0, 1, 1], [], []>} : vector<32x24xf32>, vector<24x8xf32>, vector<32x8xf32> -> vector<32x8xf32>
    %c48 = arith.constant 48 : index
    %c0_20 = arith.constant 0 : index
    %60 = vector.load %arg1[%c48, %c0_20] : memref<200x16xf32, #tpu.memory_space<vmem>>, vector<1x8xf32>
    %61 = vector.broadcast %60 : vector<1x8xf32> to vector<32x8xf32>
    %62 = arith.addf %59, %61 : vector<32x8xf32>
    %cst_21 = arith.constant 0.000000e+00 : f32
    %63 = vector.broadcast %cst_21 : f32 to vector<32x8xf32>
    %64 = arith.maximumf %62, %63 : vector<32x8xf32>
    %65 = arith.addf %64, %46 : vector<32x8xf32>
    %cst_22 = arith.constant 0.000000e+00 : f32
    %66 = vector.broadcast %cst_22 : f32 to vector<32x8xf32>
    %67 = arith.maximumf %65, %66 : vector<32x8xf32>
    %c4_i32 = arith.constant 4 : i32
    %68 = tpu.dynamic_rotate %67 by %c4_i32 dim 0 : vector<32x8xf32>, i32 -> vector<32x8xf32>
    %c0_i32_23 = arith.constant 0 : i32
    %69 = vector.broadcast %c0_i32_23 : i32 to vector<32x1xi32>
    %70 = arith.cmpi slt, %0, %69 : vector<32x1xi32>
    %c4_i32_24 = arith.constant 4 : i32
    %71 = vector.broadcast %c4_i32_24 : i32 to vector<32x1xi32>
    %72 = arith.cmpi sge, %0, %71 : vector<32x1xi32>
    %73 = arith.ori %70, %72 : vector<32x1xi1>
    %c16_i32_25 = arith.constant 16 : i32
    %74 = vector.broadcast %c16_i32_25 : i32 to vector<32x1xi32>
    %75 = arith.cmpi slt, %0, %74 : vector<32x1xi32>
    %c20_i32 = arith.constant 20 : i32
    %76 = vector.broadcast %c20_i32 : i32 to vector<32x1xi32>
    %77 = arith.cmpi sge, %0, %76 : vector<32x1xi32>
    %78 = arith.ori %75, %77 : vector<32x1xi1>
    %79 = arith.andi %73, %78 : vector<32x1xi1>
    %cst_26 = arith.constant 0.000000e+00 : f32
    %80 = vector.shape_cast %79 : vector<32x1xi1> to vector<32x1xi1>
    %81 = vector.broadcast %80 : vector<32x1xi1> to vector<32x8xi1>
    %82 = vector.broadcast %cst_26 : f32 to vector<32x8xf32>
    %83 = arith.select %81, %68, %82 : vector<32x8xi1>, vector<32x8xf32>
    %c2_i32_27 = arith.constant 2 : i32
    %84 = tpu.dynamic_rotate %67 by %c2_i32_27 dim 0 : vector<32x8xf32>, i32 -> vector<32x8xf32>
    %cst_28 = arith.constant 0.000000e+00 : f32
    %85 = vector.shape_cast %13 : vector<32x1xi1> to vector<32x1xi1>
    %86 = vector.broadcast %85 : vector<32x1xi1> to vector<32x8xi1>
    %87 = vector.broadcast %cst_28 : f32 to vector<32x8xf32>
    %88 = arith.select %86, %84, %87 : vector<32x8xi1>, vector<32x8xf32>
    %89 = tpu.concatenate %83, %88, %67 in 1 : vector<32x8xf32>, vector<32x8xf32>, vector<32x8xf32> -> vector<32x24xf32>
    %c72 = arith.constant 72 : index
    %c0_29 = arith.constant 0 : index
    %90 = vector.load %arg1[%c72, %c0_29] : memref<200x16xf32, #tpu.memory_space<vmem>>, vector<24x16xf32>
    %cst_30 = arith.constant dense<0.000000e+00> : vector<32x16xf32>
    %91 = tpu.matmul %89, %90, %cst_30 {dimension_numbers = #tpu.dot_dimension_numbers<[1], [0], [0], [1], [0, 0, 1, 1], [], []>} : vector<32x24xf32>, vector<24x16xf32>, vector<32x16xf32> -> vector<32x16xf32>
    %c96 = arith.constant 96 : index
    %c0_31 = arith.constant 0 : index
    %92 = vector.load %arg1[%c96, %c0_31] : memref<200x16xf32, #tpu.memory_space<vmem>>, vector<1x16xf32>
    %93 = vector.broadcast %92 : vector<1x16xf32> to vector<32x16xf32>
    %94 = arith.addf %91, %93 : vector<32x16xf32>
    %cst_32 = arith.constant 0.000000e+00 : f32
    %95 = vector.broadcast %cst_32 : f32 to vector<32x16xf32>
    %96 = arith.maximumf %94, %95 : vector<32x16xf32>
    %c160 = arith.constant 160 : index
    %c0_33 = arith.constant 0 : index
    %97 = vector.load %arg1[%c160, %c0_33] : memref<200x16xf32, #tpu.memory_space<vmem>>, vector<8x16xf32>
    %cst_34 = arith.constant dense<0.000000e+00> : vector<32x16xf32>
    %98 = tpu.matmul %67, %97, %cst_34 {dimension_numbers = #tpu.dot_dimension_numbers<[1], [0], [0], [1], [0, 0, 1, 1], [], []>} : vector<32x8xf32>, vector<8x16xf32>, vector<32x16xf32> -> vector<32x16xf32>
    %c168 = arith.constant 168 : index
    %c0_35 = arith.constant 0 : index
    %99 = vector.load %arg1[%c168, %c0_35] : memref<200x16xf32, #tpu.memory_space<vmem>>, vector<1x16xf32>
    %100 = vector.broadcast %99 : vector<1x16xf32> to vector<32x16xf32>
    %101 = arith.addf %98, %100 : vector<32x16xf32>
    %c4_i32_36 = arith.constant 4 : i32
    %102 = tpu.dynamic_rotate %96 by %c4_i32_36 dim 0 : vector<32x16xf32>, i32 -> vector<32x16xf32>
    %cst_37 = arith.constant 0.000000e+00 : f32
    %103 = vector.shape_cast %79 : vector<32x1xi1> to vector<32x1xi1>
    %104 = vector.broadcast %103 : vector<32x1xi1> to vector<32x16xi1>
    %105 = vector.broadcast %cst_37 : f32 to vector<32x16xf32>
    %106 = arith.select %104, %102, %105 : vector<32x16xi1>, vector<32x16xf32>
    %c2_i32_38 = arith.constant 2 : i32
    %107 = tpu.dynamic_rotate %96 by %c2_i32_38 dim 0 : vector<32x16xf32>, i32 -> vector<32x16xf32>
    %cst_39 = arith.constant 0.000000e+00 : f32
    %108 = vector.shape_cast %13 : vector<32x1xi1> to vector<32x1xi1>
    %109 = vector.broadcast %108 : vector<32x1xi1> to vector<32x16xi1>
    %110 = vector.broadcast %cst_39 : f32 to vector<32x16xf32>
    %111 = arith.select %109, %107, %110 : vector<32x16xi1>, vector<32x16xf32>
    %112 = tpu.concatenate %106, %111, %96 in 1 : vector<32x16xf32>, vector<32x16xf32>, vector<32x16xf32> -> vector<32x48xf32>
    %c104 = arith.constant 104 : index
    %c0_40 = arith.constant 0 : index
    %113 = vector.load %arg1[%c104, %c0_40] : memref<200x16xf32, #tpu.memory_space<vmem>>, vector<48x16xf32>
    %cst_41 = arith.constant dense<0.000000e+00> : vector<32x16xf32>
    %114 = tpu.matmul %112, %113, %cst_41 {dimension_numbers = #tpu.dot_dimension_numbers<[1], [0], [0], [1], [0, 0, 1, 1], [], []>} : vector<32x48xf32>, vector<48x16xf32>, vector<32x16xf32> -> vector<32x16xf32>
    %c152 = arith.constant 152 : index
    %c0_42 = arith.constant 0 : index
    %115 = vector.load %arg1[%c152, %c0_42] : memref<200x16xf32, #tpu.memory_space<vmem>>, vector<1x16xf32>
    %116 = vector.broadcast %115 : vector<1x16xf32> to vector<32x16xf32>
    %117 = arith.addf %114, %116 : vector<32x16xf32>
    %cst_43 = arith.constant 0.000000e+00 : f32
    %118 = vector.broadcast %cst_43 : f32 to vector<32x16xf32>
    %119 = arith.maximumf %117, %118 : vector<32x16xf32>
    %120 = arith.addf %119, %101 : vector<32x16xf32>
    %cst_44 = arith.constant 0.000000e+00 : f32
    %121 = vector.broadcast %cst_44 : f32 to vector<32x16xf32>
    %122 = arith.maximumf %120, %121 : vector<32x16xf32>
    %123 = vector.extract_strided_slice %122 {offsets = [15, 0], sizes = [1, 16], strides = [1, 1]} : vector<32x16xf32> to vector<1x16xf32>
    %124 = vector.extract_strided_slice %122 {offsets = [31, 0], sizes = [1, 16], strides = [1, 1]} : vector<32x16xf32> to vector<1x16xf32>
    %125 = tpu.concatenate %123, %124 in 0 : vector<1x16xf32>, vector<1x16xf32> -> vector<2x16xf32>
    %c176 = arith.constant 176 : index
    %c0_45 = arith.constant 0 : index
    %126 = vector.load %arg1[%c176, %c0_45] : memref<200x16xf32, #tpu.memory_space<vmem>>, vector<16x3xf32>
    %cst_46 = arith.constant dense<0.000000e+00> : vector<2x3xf32>
    %127 = tpu.matmul %125, %126, %cst_46 {dimension_numbers = #tpu.dot_dimension_numbers<[1], [0], [0], [1], [0, 0, 1, 1], [], []>} : vector<2x16xf32>, vector<16x3xf32>, vector<2x3xf32> -> vector<2x3xf32>
    %c192 = arith.constant 192 : index
    %c0_47 = arith.constant 0 : index
    %128 = vector.load %arg1[%c192, %c0_47] : memref<200x16xf32, #tpu.memory_space<vmem>>, vector<1x3xf32>
    %129 = vector.broadcast %128 : vector<1x3xf32> to vector<2x3xf32>
    %130 = arith.addf %127, %129 : vector<2x3xf32>
    %c0_48 = arith.constant 0 : index
    %c0_49 = arith.constant 0 : index
    %131 = vector.load %arg2[%c0_48, %c0_49] : memref<2x3xf32, #tpu.memory_space<vmem>>, vector<2x3xf32>
    tpu.vector_store %arg2[%c0_48, %c0_49], %130 {strides = array<i32>} : memref<2x3xf32, #tpu.memory_space<vmem>>, vector<2x3xf32>,
    return
  }
}

</mosaic_0001>

<bundles_post_ra>
// kernel: tpu_custom_call.1
= control target key start
LH: loop header
LB: loop body
LE: loop exit
PB: predicated region body
PF: predicated region fallthrough
CT: control target
= control target key end

     0   :  { %v12_v1 = vlaneseq  ;;  %vm143_vm0 = vcmask 31744   ;;  %s1313_s15 = smov 8   ;;  %vm173_vm1 = vcmask 1043456   ;;  %s1648_s0 = inlined_call_operand.vmem [shape: f32[32,4], index: 0, kind: input, shape index: {}]   ;;  %s1649_s1 = inlined_call_operand.vmem [shape: f32[200,16], index: 1, kind: input, shape index: {}]   ;;  %s1650_s2 = inlined_call_operand.hbm [shape: f32[2,3], index: 2, kind: output, shape index: {}]  }
   0x1   :  { %v17_v0 = vld [vmem:[%s1648_s0] sm:$0xff]  ;;  %v1341_v2 = vld [vmem:[%s1648_s0 + $0x8] sm:$0xff]  ;;  %v1346_v3 = vld [vmem:[%s1648_s0 + $0x18] sm:$0xff] }
   0x2   :  { %131 = vrot.lane.b32.xlu1 %v17_v0, %s1313_s15  ;;  %v70_v4 = vrot.slane %v17_v0, 7  ;;  %v71_v5 = vrot.slane %v1341_v2, 7  ;;  %v73_v6 = vrot.slane %v1346_v3, 7  ;;  %v1354_v7 = vld [vmem:[%s1648_s0 + $0x10] sm:$0xff]  ;;  %1221 = vmatprep.mubr.msk.f32.mxu1 %vm143_vm0, %v17_v0  ;;  %v1357_v8 = vshrl.u32 %v12_v1, 7 }
   0x3   :  { %v72_v9 = vrot.slane %v1354_v7, 7  ;;  %v154_v10 = vld [vmem:[%s1649_s1 + $0x8] sm:$0xf] }
   0x4   :  { %7 = vsyncpa [#allocation3], 0  ;;  %vm74_vm2 = vcmp.lt.s32.totalorder %v1357_v8, 1  ;;  %vm79_vm3 = vcmp.ge.s32.totalorder %v1357_v8, 1  ;;  %v1366_v11 = vadd.s32 16, %v1357_v8  ;;  %1209 = vmatprep.subr.msk.mxu0 %vm173_vm1, %v154_v10  ;;  %v153_v12 = vld [vmem:[%s1649_s1] sm:$0xff] }
   0x5   :  { %v77_v13 = vsel %vm74_vm2, %v70_v4, %v71_v5  ;;  %v78_v14 = vsel %vm74_vm2, %v73_v6, %v70_v4  ;;  %s1314_s21 = smov 4   ;;  %v75_v15 = vsel %vm74_vm2, %v72_v9, %v73_v6  ;;  %1210 = vmatpush3.msk.msra.mxu0 %vm173_vm1, %v154_v10  ;;  %v76_v17 = vsel %vm74_vm2, %v71_v5, %v72_v9  ;;  %v266_v45 = vld [vmem:[%s1649_s1 + $0x38] sm:$0xf]  ;;  %v1132_v46 = vld [vmem:[%s1649_s1 + $0x10] ss:$0 sm:$0xff]  ;;  %v435_v47 = vld [vmem:[%s1649_s1 + $0x28] sm:$0xff] }
   0x6   :  { %133 = vrot.lane.b32.xlu1 %v1341_v2, %s1313_s15  ;;  %117 = vrot.lane.b32.xlu0 %v77_v13, %s1314_s21  ;;  %v107_v16 = vsel %vm79_vm3, %v78_v14, 0.0  ;;  %vm89_vm4 = vcmp.ge.s32.totalorder %v1366_v11, 17  ;;  %v24_v20 = vrot.slane %v1346_v3, 6  ;;  %v21_v21 = vrot.slane %v17_v0, 6  ;;  %v434_v48 = vld [vmem:[%s1649_s1 + $0x20] sm:$0xff]  ;;  %v433_v54 = vld [vmem:[%s1649_s1 + $0x18] sm:$0xff] }
   0x7   :  { %1211 = vmatprep.subr.mxu0 %v153_v12  ;;  %v109_v18 = vsel %vm89_vm4, %v76_v17, 0.0  ;;  %v22_v22 = vrot.slane %v1341_v2, 6  ;;  %vm25_vm5 = vcmp.lt.s32.totalorder %v1357_v8, 2  ;;  %vm34_vm6 = vcmp.ge.s32.totalorder %v1357_v8, 2  ;;  %1219 = vmatprep.subr.msk.mxu1 %vm173_vm1, %v266_v45  ;;  %s1315_s4 = smov 16   ;;  %s1316_s30 = smov 32  }
   0x8   :  { %1212 = vmatpush3.msra.mxu0 %v153_v12  ;;  %v29_v24 = vsel %vm25_vm5, %v24_v20, %v21_v21  ;;  %v23_v28 = vrot.slane %v1354_v7, 6  ;;  %vm148_vm7 = vcmask 64512   ;;  %vm160_vm8 = vcmask 97280   ;;  %1220 = vmatpush3.msk.msra.mxu1 %vm173_vm1, %v266_v45  ;;  %s1319_s13 = smov [#allocation2]  }
   0x9   :  { %v28_v26 = vsel %vm25_vm5, %v21_v21, %v22_v22  ;;  %v66_v27 = vsel %vm34_vm6, %v29_v24, 0.0  ;;  %vm48_vm9 = vcmp.ge.s32.totalorder %v1366_v11, 18  ;;  %1222 = vmatmul.mubr.msk.f32.vlgmr.msra.gmra.mxu1 %vm143_vm0, %v1341_v2  ;;  %1227 = vmatprep.subr.mxu1 %v435_v47  ;;  %vm428_vm10 = vcmask 130048   ;;  %s1124_s14 = sshll.u32 %s1319_s13, 4  ;;  %s1125_s14 = int_to_ptr.vmem [resolvable:$true] %s1124_s14 }
   0xa   :  { %121 = vrot.lane.b32.xlu1 %v75_v15, %s1314_s21  ;;  %115 = vrot.lane.b32.xlu0 %v107_v16, %s1314_s21  ;;  %v27_v34 = vsel %vm25_vm5, %v22_v22, %v23_v28  ;;  %v26_v36 = vsel %vm25_vm5, %v23_v28, %v24_v20  ;;  %vm441_vm11 = vcmask 195584   ;;  %vm555_vm12 = vcmp.lt.s32.totalorder %v1357_v8, 4  ;;  %s1291_s16 = scalar_lea.vmem %s1125_s14, 32  ;;  %p1296_p1 = scmp.lt.s32.totalorder %s1125_s14, %s1125_s14 }
   0xb   :  { %v68_v38 = vsel %vm48_vm9, %v27_v34, 0.0  ;;  %1224 = vmatprep.mubr.msk.f32.mxu1 %vm143_vm0, %v1354_v7  ;;  %1228 = vmatpush3.msra.mxu1 %v435_v47  ;;  %v645_v47 = vld [vmem:[%s1649_s1 + $0x50] sm:$0xff]  ;;  %vm560_vm13 = vcmp.ge.s32.totalorder %v1357_v8, 4  ;;  %vm570_vm14 = vcmp.ge.s32.totalorder %v1366_v11, 20  ;;  %vm910_vm15 = vcmask 261120   ;;  %v1037_v11 = vld [vmem:[%s1649_s1 + $0xb8] sm:$0xff]  ;;  %p1292_p0 = scmp.ne.s32.totalorder %s1125_s14, %s1291_s16  ;;  %p1297_p2 = scmp.lt.s32.totalorder %s1291_s16, %s1291_s16 }
   0xc   :  { %1229 = vmatprep.subr.mxu1 %v434_v48  ;;  %vm1318_vm1 = vmmov 0  }
   0xd   :  { %1225 = vmatmul.mubr.msk.f32.gmra.mxu1 %vm143_vm0, %v1346_v3  ;;  %p1298_p3 = por %p1297_p2, %p1296_p1 }
   0xe   :  { %137 = vrot.lane.b32.xlu1 %v1346_v3, %s1313_s15  ;;  %119 = vrot.lane.b32.xlu0 %v109_v18, %s1314_s21 }
   0xf   :  { %1230 = vmatpush3.msra.mxu1 %v434_v48  ;;  %p1299_p4 = pnand %p1298_p3, %p1292_p0 }
  0x10   :  { %1231 = vmatprep.subr.mxu1 %v433_v54 }
  0x11   :  { %1232 = vmatpush3.msra.mxu1 %v433_v54 }
  0x12   :  { %135 = vrot.lane.b32.xlu0 %v1354_v7, %s1313_s15 }
  0x74   :  { %v132_v19 = vpop.permute.xlu1 %131 }
  0x78   :  { %v134_v23 = vpop.permute.xlu1 %133  ;;  %v118_v25 = vpop.permute.xlu0 %117 }
  0x79   :  { %v145_v29 = vsel %vm143_vm0, %v28_v26, %v118_v25 }
  0x7a   :  { %v150_v35 = vsel %vm148_vm7, %v145_v29, %v134_v23 }
  0x7c   :  { %v116_v30 = vpop.permute.xlu0 %115  ;;  %v122_v32 = vpop.permute.xlu1 %121 }
  0x7d   :  { %v144_v31 = vsel %vm143_vm0, %v66_v27, %v116_v30  ;;  %v147_v39 = vsel %vm143_vm0, %v26_v36, %v122_v32  ;;  %v753_v36 = vld [vmem:[%s1649_s1 + $0xa0] sm:$0xff] }
  0x7e   :  { %v149_v33 = vsel %vm148_vm7, %v144_v31, %v132_v19  ;;  %1251 = vmatprep.subr.mxu1 %v753_v36 }
  0x7f   :  { %1213 = vmatprep.mubr.msk.f32.mxu0 %vm160_vm8, %v149_v33 }
  0x80   :  { %1214 = vmatmul.mubr.msk.f32.vlgmr.msra.gmra.mxu0 %vm160_vm8, %v150_v35  ;;  %v120_v37 = vpop.permute.xlu0 %119  ;;  %v138_v40 = vpop.permute.xlu1 %137 }
  0x81   :  { %v146_v41 = vsel %vm143_vm0, %v68_v38, %v120_v37  ;;  %v152_v44 = vsel %vm148_vm7, %v147_v39, %v138_v40  ;;  %vm926_vm0 = vcmask 392192  }
  0x84   :  { %v136_v42 = vpop.permute.xlu0 %135 }
  0x85   :  { %v151_v43 = vsel %vm148_vm7, %v146_v41, %v136_v42  ;;  %v1144_v41 = vld [vmem:[%s1649_s1 + $0x30] ss:$0 sm:$0xff]  ;;  %v1138_v42 = vld [vmem:[%s1649_s1 + $0x40] ss:$0 sm:$0xff] }
  0x86   :  { %1216 = vmatprep.mubr.msk.f32.mxu0 %vm160_vm8, %v151_v43 }
  0x87   :  { %1217 = vmatmul.mubr.msk.f32.gmra.mxu0 %vm160_vm8, %v152_v44 }
  0xc9   :  { %v1223_v37 = vpop.f32.mrf.mxu1 }
  0xca   :  { %v355_v48 = vadd.f32 %v1223_v37, %v1138_v42 }
  0xcb   :  { %v349_v38 = vpop.f32.mrf.mxu1 }
  0xcd   :  { %v1226_v39 = vpop.f32.mrf.mxu1 }
  0xcf   :  { %v359_v40 = vpop.f32.mrf.mxu1 }
 0x140   :  { %v1215_v49 = vpop.f32.mrf.mxu0 }
 0x141   :  { %v249_v50 = vadd.f32 %v1215_v49, %v1132_v46 }
 0x142   :  { %v243_v51 = vpop.f32.mrf.mxu0 }
 0x143   :  { %v263_v52 = vmax.f32 %v249_v50, 0.0  ;;  %v244_v53 = vadd.f32 %v1132_v46, %v243_v51  ;;  %v350_v51 = vadd.f32 %v1138_v42, %v349_v38 }
 0x145   :  { %v262_v55 = vmax.f32 %v244_v53, 0.0  ;;  %414 = vrot.lane.b32.xlu1 %v263_v52, %s1315_s4  ;;  %v369_v56 = vrot.slane %v263_v52, 6  ;;  %v381_v57 = vrot.slane %v263_v52, 7 }
 0x147   :  { %v368_v58 = vrot.slane %v262_v55, 6  ;;  %v380_v59 = vrot.slane %v262_v55, 7  ;;  %412 = vrot.lane.b32.xlu0 %v262_v55, %s1315_s4  ;;  %v1218_v60 = vpop.f32.mrf.mxu0 }
 0x148   :  { %v259_v61 = vadd.f32 %v1218_v60, %v1132_v46 }
 0x149   :  { %v253_v62 = vpop.f32.mrf.mxu0  ;;  %v386_v63 = vsel %vm74_vm2, %v380_v59, %v381_v57  ;;  %v374_v0 = vsel %vm25_vm5, %v368_v58, %v369_v56 }
 0x14a   :  { %v265_v1 = vmax.f32 %v259_v61, 0.0  ;;  %v254_v2 = vadd.f32 %v1132_v46, %v253_v62  ;;  %398 = vrot.lane.b32.xlu1 %v386_v63, %s1313_s15  ;;  %v646_v46 = vld [vmem:[%s1649_s1 + $0x58] sm:$0xff]  ;;  %v365_v61 = vadd.f32 %v1226_v39, %v1138_v42 }
 0x14b   :  { %1239 = vmatprep.subr.mxu0 %v646_v46 }
 0x14c   :  { %v371_v3 = vrot.slane %v265_v1, 6  ;;  %v383_v4 = vrot.slane %v265_v1, 7  ;;  %v264_v5 = vmax.f32 %v254_v2, 0.0  ;;  %1240 = vmatpush3.msra.mxu0 %v646_v46 }
 0x14d   :  { %1241 = vmatprep.subr.mxu0 %v645_v47 }
 0x14e   :  { %v370_v6 = vrot.slane %v264_v5, 6  ;;  %v382_v7 = vrot.slane %v264_v5, 7  ;;  %v387_v9 = vsel %vm74_vm2, %v383_v4, %v380_v59  ;;  %v375_v10 = vsel %vm25_vm5, %v371_v3, %v368_v58  ;;  %1242 = vmatpush3.msra.mxu0 %v645_v47 }
 0x14f   :  { %v388_v12 = vsel %vm79_vm3, %v387_v9, 0.0  ;;  %v376_v23 = vsel %vm34_vm6, %v375_v10, 0.0  ;;  %vm1116_vm3 = vcmask 17408  }
 0x150   :  { %396 = vrot.lane.b32.xlu0 %v388_v12, %s1313_s15  ;;  %v384_v13 = vsel %vm74_vm2, %v382_v7, %v383_v4  ;;  %v385_v14 = vsel %vm74_vm2, %v381_v57, %v382_v7  ;;  %v372_v15 = vsel %vm25_vm5, %v370_v6, %v371_v3  ;;  %v373_v16 = vsel %vm25_vm5, %v369_v56, %v370_v6  ;;  %v644_v57 = vld [vmem:[%s1649_s1 + $0x48] sm:$0xff] }
 0x151   :  { %402 = vrot.lane.b32.xlu1 %v384_v13, %s1313_s15  ;;  %v390_v17 = vsel %vm89_vm4, %v385_v14, 0.0  ;;  %v378_v29 = vsel %vm48_vm9, %v373_v16, 0.0  ;;  %1243 = vmatprep.subr.mxu0 %v644_v57  ;;  %v360_v4 = vadd.f32 %v1138_v42, %v359_v40  ;;  %vm1034_vm2 = vcmask 1040384  }
 0x152   :  { %1244 = vmatpush3.msra.mxu0 %v644_v57 }
 0x154   :  { %400 = vrot.lane.b32.xlu0 %v390_v17, %s1313_s15 }
 0x155   :  { %418 = vrot.lane.b32.xlu1 %v265_v1, %s1315_s4 }
 0x158   :  { %416 = vrot.lane.b32.xlu0 %v264_v5, %s1315_s4 }
 0x1b7   :  { %v415_v18 = vpop.permute.xlu1 %414 }
 0x1b9   :  { %v413_v19 = vpop.permute.xlu0 %412 }
 0x1bc   :  { %v399_v20 = vpop.permute.xlu1 %398 }
 0x1bd   :  { %v425_v21 = vsel %vm148_vm7, %v374_v0, %v399_v20 }
 0x1be   :  { %v430_v27 = vsel %vm428_vm10, %v425_v21, %v415_v18 }
 0x1c2   :  { %v397_v22 = vpop.permute.xlu0 %396 }
 0x1c3   :  { %v424_v24 = vsel %vm148_vm7, %v376_v23, %v397_v22  ;;  %v403_v25 = vpop.permute.xlu1 %402 }
 0x1c4   :  { %v429_v26 = vsel %vm428_vm10, %v424_v24, %v413_v19  ;;  %v427_v33 = vsel %vm148_vm7, %v372_v15, %v403_v25 }
 0x1c5   :  { %1233 = vmatprep.mubr.msk.f32.mxu1 %vm441_vm11, %v429_v26 }
 0x1c6   :  { %1234 = vmatmul.mubr.msk.f32.vlgmr.msra.gmra.mxu1 %vm441_vm11, %v430_v27  ;;  %v401_v28 = vpop.permute.xlu0 %400 }
 0x1c7   :  { %v419_v30 = vpop.permute.xlu1 %418  ;;  %v426_v31 = vsel %vm148_vm7, %v378_v29, %v401_v28  ;;  %1252 = vmatpush3.msra.mxu1 %v753_v36 }
 0x1c8   :  { %v432_v35 = vsel %vm428_vm10, %v427_v33, %v419_v30 }
 0x1ca   :  { %v417_v32 = vpop.permute.xlu0 %416 }
 0x1cb   :  { %v431_v34 = vsel %vm428_vm10, %v426_v31, %v417_v32 }
 0x1cc   :  { %1236 = vmatprep.mubr.msk.f32.mxu1 %vm441_vm11, %v431_v34 }
 0x1cd   :  { %1237 = vmatmul.mubr.msk.f32.gmra.mxu1 %vm441_vm11, %v432_v35 }
 0x286   :  { %v1235_v43 = vpop.f32.mrf.mxu1 }
 0x287   :  { %v526_v44 = vadd.f32 %v1235_v43, %v1144_v41 }
 0x288   :  { %v520_v45 = vpop.f32.mrf.mxu1 }
 0x289   :  { %v540_v49 = vmax.f32 %v526_v44, 0.0  ;;  %v521_v50 = vadd.f32 %v1144_v41, %v520_v45 }
 0x28b   :  { %v544_v52 = vadd.f32 %v540_v49, %v355_v48  ;;  %v539_v53 = vmax.f32 %v521_v50, 0.0  ;;  %v920_v48 = vld [vmem:[%s1649_s1 + $0x90] sm:$0xff]  ;;  %v919_v49 = vld [vmem:[%s1649_s1 + $0x88] sm:$0xff]  ;;  %v918_v50 = vld [vmem:[%s1649_s1 + $0x80] sm:$0xff] }
 0x28c   :  { %1259 = vmatprep.subr.mxu0 %v920_v48 }
 0x28d   :  { %v548_v54 = vmax.f32 %v544_v52, 0.0  ;;  %v543_v55 = vadd.f32 %v539_v53, %v350_v51  ;;  %v1238_v56 = vpop.f32.mrf.mxu1  ;;  %v1149_v51 = vld [vmem:[%s1649_s1 + $0x60] ss:$0 sm:$0xff]  ;;  %v917_v52 = vld [vmem:[%s1649_s1 + $0x78] sm:$0xff]  ;;  %v916_v53 = vld [vmem:[%s1649_s1 + $0x70] sm:$0xff] }
 0x28e   :  { %v536_v58 = vadd.f32 %v1238_v56, %v1144_v41 }
 0x28f   :  { %v547_v59 = vmax.f32 %v543_v55, 0.0  ;;  %626 = vrot.lane.b32.xlu1 %v548_v54, %s1315_s4  ;;  %v530_v60 = vpop.f32.mrf.mxu1  ;;  %v593_v1 = vrot.slane %v548_v54, 6  ;;  %v552_v3 = vrot.slane %v548_v54, 4 }
 0x290   :  { %v542_v62 = vmax.f32 %v536_v58, 0.0  ;;  %v531_v63 = vadd.f32 %v1144_v41, %v530_v60 }
 0x291   :  { %624 = vrot.lane.b32.xlu0 %v547_v59, %s1315_s4  ;;  %1253 = vmatprep.mubr.msk.f32.mxu1 %vm148_vm7, %v547_v59  ;;  %v592_v0 = vrot.slane %v547_v59, 6  ;;  %v551_v2 = vrot.slane %v547_v59, 4  ;;  %v915_v59 = vld [vmem:[%s1649_s1 + $0x68] sm:$0xff] }
 0x292   :  { %v546_v5 = vadd.f32 %v542_v62, %v365_v61  ;;  %v541_v6 = vmax.f32 %v531_v63, 0.0  ;;  %1254 = vmatmul.mubr.msk.f32.vlgmr.msra.gmra.mxu1 %vm148_vm7, %v548_v54 }
 0x293   :  { %v598_v7 = vsel %vm25_vm5, %v592_v0, %v593_v1  ;;  %v558_v9 = vsel %vm555_vm12, %v551_v2, %v552_v3 }
 0x294   :  { %v550_v10 = vmax.f32 %v546_v5, 0.0  ;;  %v545_v12 = vadd.f32 %v541_v6, %v360_v4  ;;  %610 = vrot.lane.b32.xlu1 %v598_v7, %s1313_s15 }
 0x296   :  { %v549_v13 = vmax.f32 %v545_v12, 0.0  ;;  %v595_v14 = vrot.slane %v550_v10, 6  ;;  %v554_v15 = vrot.slane %v550_v10, 4 }
 0x298   :  { %1256 = vmatprep.mubr.msk.f32.mxu1 %vm148_vm7, %v549_v13  ;;  %v599_v16 = vsel %vm25_vm5, %v595_v14, %v592_v0  ;;  %v594_v17 = vrot.slane %v549_v13, 6  ;;  %v559_v18 = vsel %vm555_vm12, %v554_v15, %v551_v2  ;;  %v553_v19 = vrot.slane %v549_v13, 4 }
 0x299   :  { %1257 = vmatmul.mubr.msk.f32.gmra.mxu1 %vm148_vm7, %v550_v10  ;;  %v600_v20 = vsel %vm34_vm6, %v599_v16, 0.0  ;;  %v588_v31 = vsel %vm560_vm13, %v559_v18, 0.0 }
 0x29a   :  { %608 = vrot.lane.b32.xlu0 %v600_v20, %s1313_s15  ;;  %v596_v21 = vsel %vm25_vm5, %v594_v17, %v595_v14  ;;  %v597_v22 = vsel %vm25_vm5, %v593_v1, %v594_v17  ;;  %v556_v23 = vsel %vm555_vm12, %v553_v19, %v554_v15  ;;  %v557_v24 = vsel %vm555_vm12, %v552_v3, %v553_v19 }
 0x29b   :  { %614 = vrot.lane.b32.xlu1 %v596_v21, %s1313_s15  ;;  %v602_v25 = vsel %vm48_vm9, %v597_v22, 0.0  ;;  %v590_v37 = vsel %vm570_vm14, %v557_v24, 0.0 }
 0x29e   :  { %612 = vrot.lane.b32.xlu0 %v602_v25, %s1313_s15 }
 0x29f   :  { %630 = vrot.lane.b32.xlu1 %v550_v10, %s1315_s4 }
 0x2a2   :  { %628 = vrot.lane.b32.xlu0 %v549_v13, %s1315_s4 }
 0x301   :  { %v627_v26 = vpop.permute.xlu1 %626 }
 0x303   :  { %v625_v27 = vpop.permute.xlu0 %624 }
 0x306   :  { %v611_v28 = vpop.permute.xlu1 %610 }
 0x307   :  { %v637_v29 = vsel %vm148_vm7, %v558_v9, %v611_v28 }
 0x308   :  { %v641_v35 = vsel %vm428_vm10, %v637_v29, %v627_v26 }
 0x30c   :  { %v609_v30 = vpop.permute.xlu0 %608 }
 0x30d   :  { %v636_v32 = vsel %vm148_vm7, %v588_v31, %v609_v30  ;;  %v615_v33 = vpop.permute.xlu1 %614 }
 0x30e   :  { %v640_v34 = vsel %vm428_vm10, %v636_v32, %v625_v27  ;;  %v639_v41 = vsel %vm148_vm7, %v556_v23, %v615_v33 }
 0x30f   :  { %1245 = vmatprep.mubr.msk.f32.mxu0 %vm441_vm11, %v640_v34 }
 0x310   :  { %1246 = vmatmul.mubr.msk.f32.vlgmr.msra.gmra.mxu0 %vm441_vm11, %v641_v35  ;;  %v613_v36 = vpop.permute.xlu0 %612 }
 0x311   :  { %v631_v38 = vpop.permute.xlu1 %630  ;;  %v638_v39 = vsel %vm148_vm7, %v590_v37, %v613_v36  ;;  %1260 = vmatpush3.msra.mxu0 %v920_v48  ;;  %v1154_v48 = vld [vmem:[%s1649_s1 + $0xa8] ss:$0 sm:$0xff] }
 0x312   :  { %v643_v43 = vsel %vm428_vm10, %v639_v41, %v631_v38  ;;  %1261 = vmatprep.subr.mxu0 %v919_v49  ;;  %v1036_v41 = vld [vmem:[%s1649_s1 + $0xb0] sm:$0xff] }
 0x313   :  { %1262 = vmatpush3.msra.mxu0 %v919_v49 }
 0x314   :  { %v629_v40 = vpop.permute.xlu0 %628  ;;  %1263 = vmatprep.subr.mxu0 %v918_v50 }
 0x315   :  { %v642_v42 = vsel %vm428_vm10, %v638_v39, %v629_v40  ;;  %1264 = vmatpush3.msra.mxu0 %v918_v50  ;;  %v1317_v40 = vmov 0.0  }
 0x316   :  { %1248 = vmatprep.mubr.msk.f32.mxu0 %vm441_vm11, %v642_v42  ;;  %1265 = vmatprep.subr.mxu0 %v917_v52  ;;  %v1159_v42 = vld [vmem:[%s1649_s1 + $0x98] ss:$0 sm:$0xff] }
 0x317   :  { %1249 = vmatmul.mubr.msk.f32.gmra.mxu0 %vm441_vm11, %v643_v43  ;;  %1277 = vmatprep.subr.mxu1 %v1317_v40 }
 0x318   :  { %1266 = vmatpush3.msra.mxu0 %v917_v52  ;;  %1278 = vmatpush3.msra.mxu1 %v1037_v11 }
 0x319   :  { %1267 = vmatprep.subr.mxu0 %v916_v53  ;;  %1279 = vmatprep.subr.mxu1 %v1317_v40 }
 0x31a   :  { %1268 = vmatpush3.msra.mxu0 %v916_v53  ;;  %1281 = vmatprep.mubr.msk.f32.mxu1 %vm1318_vm1, %v1317_v40 }
 0x31b   :  { %1269 = vmatprep.subr.mxu0 %v915_v59  ;;  %1280 = vmatpush3.msra.mxu1 %v1036_v41 }
 0x31c   :  { %1270 = vmatpush3.msra.mxu0 %v915_v59 }
 0x352   :  { %v1558_v44 = vpop.f32.mrf.mxu1 }
 0x353   :  { %v838_v50 = vadd.f32 %v1558_v44, %v1154_v48  ;;  %v1164_v44 = vld [vmem:[%s1649_s1 + $0xc0] ss:$0 sm:$0xff] }
 0x354   :  { %v833_v45 = vpop.f32.mrf.mxu1 }
 0x359   :  { %v1560_v46 = vpop.f32.mrf.mxu1 }
 0x35b   :  { %v842_v47 = vpop.f32.mrf.mxu1 }
 0x3d0   :  { %v1247_v54 = vpop.f32.mrf.mxu0 }
 0x3d1   :  { %v736_v55 = vadd.f32 %v1247_v54, %v1149_v51 }
 0x3d2   :  { %v730_v56 = vpop.f32.mrf.mxu0 }
 0x3d3   :  { %v750_v57 = vmax.f32 %v736_v55, 0.0  ;;  %v731_v58 = vadd.f32 %v1149_v51, %v730_v56  ;;  %v847_v55 = vadd.f32 %v1560_v46, %v1154_v48 }
 0x3d5   :  { %v749_v60 = vmax.f32 %v731_v58, 0.0  ;;  %896 = vrot.lane.b32.xlu1 %v750_v57, %s1316_s30  ;;  %v851_v61 = vrot.slane %v750_v57, 4  ;;  %v863_v62 = vrot.slane %v750_v57, 6 }
 0x3d7   :  { %v850_v63 = vrot.slane %v749_v60, 4  ;;  %v862_v0 = vrot.slane %v749_v60, 6  ;;  %894 = vrot.lane.b32.xlu0 %v749_v60, %s1316_s30  ;;  %v1250_v1 = vpop.f32.mrf.mxu0 }
 0x3d8   :  { %v746_v2 = vadd.f32 %v1250_v1, %v1149_v51 }
 0x3d9   :  { %v740_v3 = vpop.f32.mrf.mxu0  ;;  %v868_v4 = vsel %vm25_vm5, %v862_v0, %v863_v62  ;;  %v856_v5 = vsel %vm555_vm12, %v850_v63, %v851_v61 }
 0x3da   :  { %v752_v6 = vmax.f32 %v746_v2, 0.0  ;;  %v741_v7 = vadd.f32 %v1149_v51, %v740_v3  ;;  %880 = vrot.lane.b32.xlu1 %v868_v4, %s1315_s4 }
 0x3dc   :  { %v853_v9 = vrot.slane %v752_v6, 4  ;;  %v865_v10 = vrot.slane %v752_v6, 6  ;;  %v751_v12 = vmax.f32 %v741_v7, 0.0 }
 0x3de   :  { %v852_v13 = vrot.slane %v751_v12, 4  ;;  %v864_v14 = vrot.slane %v751_v12, 6  ;;  %v869_v15 = vsel %vm25_vm5, %v865_v10, %v862_v0  ;;  %v857_v16 = vsel %vm555_vm12, %v853_v9, %v850_v63 }
 0x3df   :  { %v870_v17 = vsel %vm34_vm6, %v869_v15, 0.0  ;;  %v858_v28 = vsel %vm560_vm13, %v857_v16, 0.0 }
 0x3e0   :  { %878 = vrot.lane.b32.xlu0 %v870_v17, %s1315_s4  ;;  %v866_v18 = vsel %vm25_vm5, %v864_v14, %v865_v10  ;;  %v867_v19 = vsel %vm25_vm5, %v863_v62, %v864_v14  ;;  %v854_v20 = vsel %vm555_vm12, %v852_v13, %v853_v9  ;;  %v855_v21 = vsel %vm555_vm12, %v851_v61, %v852_v13 }
 0x3e1   :  { %884 = vrot.lane.b32.xlu1 %v866_v18, %s1315_s4  ;;  %v872_v22 = vsel %vm48_vm9, %v867_v19, 0.0  ;;  %v860_v34 = vsel %vm570_vm14, %v855_v21, 0.0 }
 0x3e4   :  { %882 = vrot.lane.b32.xlu0 %v872_v22, %s1315_s4 }
 0x3e5   :  { %900 = vrot.lane.b32.xlu1 %v752_v6, %s1316_s30 }
 0x3e8   :  { %898 = vrot.lane.b32.xlu0 %v751_v12, %s1316_s30 }
 0x447   :  { %v897_v23 = vpop.permute.xlu1 %896 }
 0x449   :  { %v895_v24 = vpop.permute.xlu0 %894 }
 0x44c   :  { %v881_v25 = vpop.permute.xlu1 %880 }
 0x44d   :  { %v907_v26 = vsel %vm428_vm10, %v856_v5, %v881_v25 }
 0x44e   :  { %v912_v32 = vsel %vm910_vm15, %v907_v26, %v897_v23 }
 0x452   :  { %v879_v27 = vpop.permute.xlu0 %878 }
 0x453   :  { %v906_v29 = vsel %vm428_vm10, %v858_v28, %v879_v27  ;;  %v885_v30 = vpop.permute.xlu1 %884 }
 0x454   :  { %v911_v31 = vsel %vm910_vm15, %v906_v29, %v895_v24  ;;  %v909_v37 = vsel %vm428_vm10, %v854_v20, %v885_v30 }
 0x455   :  { %1271 = vmatprep.mubr.msk.f32.mxu0 %vm926_vm0, %v911_v31 }
 0x456   :  { %1272 = vmatmul.mubr.msk.f32.vlgmr.msra.gmra.mxu0 %vm926_vm0, %v912_v32  ;;  %v883_v33 = vpop.permute.xlu0 %882 }
 0x457   :  { %v901_v35 = vpop.permute.xlu1 %900  ;;  %v908_v8 = vsel %vm428_vm10, %v860_v34, %v883_v33 }
 0x458   :  { %v914_v39 = vsel %vm910_vm15, %v909_v37, %v901_v35 }
 0x45a   :  { %v899_v36 = vpop.permute.xlu0 %898 }
 0x45b   :  { %v913_v38 = vsel %vm910_vm15, %v908_v8, %v899_v36 }
 0x45c   :  { %1274 = vmatprep.mubr.msk.f32.mxu0 %vm926_vm0, %v913_v38 }
 0x45d   :  { %1275 = vmatmul.mubr.msk.f32.gmra.mxu0 %vm926_vm0, %v914_v39 }
 0x516   :  { %v1273_v43 = vpop.f32.mrf.mxu0 }
 0x517   :  { %v1010_v45 = vadd.f32 %v1273_v43, %v1159_v42 }
 0x518   :  { %v1005_v47 = vpop.f32.mrf.mxu0 }
 0x519   :  { %v1022_v49 = vmax.f32 %v1010_v45, 0.0 }
 0x51b   :  { %v1024_v52 = vadd.f32 %v1022_v49, %v838_v50 }
 0x51d   :  { %v1276_v51 = vpop.f32.mrf.mxu0  ;;  %v1026_v57 = vmax.f32 %v1024_v52, 0.0 }
 0x51e   :  { %v1019_v53 = vadd.f32 %v1276_v51, %v1159_v42 }
 0x51f   :  { %v1014_v54 = vpop.f32.mrf.mxu0  ;;  %v1029_v60 = vrot.slane %v1026_v57, 7 }
 0x520   :  { %v1023_v56 = vmax.f32 %v1019_v53, 0.0 }
 0x522   :  { %v1025_v58 = vadd.f32 %v1023_v56, %v847_v55 }
 0x524   :  { %v1027_v59 = vmax.f32 %v1025_v58, 0.0 }
 0x526   :  { %v1032_v61 = vrot.slane %v1027_v59, 6 }
 0x528   :  { %v1035_v62 = vsel %vm1034_vm2, %v1029_v60, %v1032_v61 }
 0x529   :  { %1282 = vmatmul.mubr.msk.f32.vlgmr.msra.gmra.mxu1 %vm428_vm10, %v1035_v62 }
 0x5e9   :  { %v1112_v63 = vpop.f32.mrf.mxu1 }
 0x5ea   :  { %v1113_v0 = vadd.f32 %v1164_v44, %v1112_v63 }
 0x5eb   :  { %v1283_v46 = vpop.f32.mrf.mxu1 }
 0x5ec   :  { %1117 = vst.msk [vmem:[#allocation2] sm:$0x3] %vm1116_vm3, %v1113_v0 }
 0x5ed   :  { %1302 = shalt.err (!%p1299_p4)
}
 0x5ee   :  { %1127 = dma.vmem_to_hbm [thread:$0]  %s1125_s14, 32, %s1650_s2, [#allocation3]  }
 0x5ef   :  { %1311 = dma.done.wait [#allocation3], 32  }
 0x5f0   :  { %1312 = vsyncadd [#allocation3], 4294967264 }
 0x5f1   :  { %1131 = vsyncpa [#allocation3], 1 }

</bundles_post_ra>
